<compile_context>
chip_gen: v7x
topology: tpu7x:2x2x1
jax: 0.10.0
libtpu: 0.0.40
codegen_flags: <defaults>
</compile_context>

<pallas_src>
import math

import jax
import jax.numpy as jnp
from jax.experimental import pallas as pl
from jax.experimental.pallas import tpu as pltpu


def equalized_conv2d(x_nchw, weight_oihw, bias, *, he_val):
    """EqualizedLayer(nn.Conv2d(Cin, Cout, 3, padding=1)) forward pass."""
    N, CIN, H, W = x_nchw.shape
    COUT, cin_w, KH, KW = weight_oihw.shape
    assert CIN == cin_w
    pad = KH // 2                       # "same" padding for the 3x3 kernel
    HP, WP = H + 2 * pad, W + 2 * pad
    K = CIN * KH * KW

    # Lane-dense im2col column count per image.  Columns enumerate (h, w')
    # with w' in [0, WP): the w' >= W columns are junk and sliced off below.
    MP = pl.cdiv(H * WP, 128) * 128                       # 384
    max_off = (KH - 1) * WP + (KW - 1)                    # 38
    LPAD = pl.cdiv(max(HP * WP, max_off + MP), 128) * 128  # 512

    # ---- thin wrapper glue: spatial zero-pad, flatten rows, pad lanes ------
    x_pad = jnp.pad(x_nchw, ((0, 0), (0, 0), (pad, pad), (pad, pad)))
    x_flat = x_pad.reshape(N, CIN, HP * WP)
    x_flat = jnp.pad(x_flat, ((0, 0), (0, 0), (0, LPAD - HP * WP)))

    # Weights (Cout, Cin*KH*KW) with he_val folded in, bf16 for the MXU.
    w2 = (weight_oihw.reshape(COUT, K) * he_val).astype(jnp.bfloat16)
    b2 = (bias * he_val).reshape(COUT, 1).astype(jnp.float32)

    def kernel(x_ref, w_ref, b_ref, o_ref, p_ref):
        # x_ref: (1, CIN, LPAD) one row-flattened padded image
        # w_ref: (COUT, K) bf16, he_val pre-folded
        # b_ref: (COUT, 1) f32
        # o_ref: (1, COUT, MP) f32, lane-dense transposed output tile
        # p_ref: (K, MP) f32 VMEM scratch (transposed im2col tile)
        #
        # In-VMEM im2col: tap row k = (ci, dy, dx) is a lane-contiguous
        # shifted window of the flattened padded image (all indices static).
        for ci in range(CIN):
            for dy in range(KH):
                for dx in range(KW):
                    k = (ci * KH + dy) * KW + dx
                    off = dy * WP + dx
                    p_ref[k:k + 1, :] = x_ref[0, ci:ci + 1, off:off + MP]
        # bf16 operands on the MXU, f32 accumulation, bias epilogue.
        acc = jnp.dot(w_ref[...], p_ref[...].astype(jnp.bfloat16),
                      preferred_element_type=jnp.float32)
        o_ref[0, :, :] = (acc + b_ref[...]).astype(o_ref.dtype)

    out = pl.pallas_call(
        kernel,
        out_shape=jax.ShapeDtypeStruct((N, COUT, MP), x_nchw.dtype),
        grid_spec=pltpu.PrefetchScalarGridSpec(
            num_scalar_prefetch=0,
            grid=(N,),   # even grid -> both v7x TCs busy; 2 cheap steps on v5e/v6e
            in_specs=[
                pl.BlockSpec((1, CIN, LPAD), lambda n: (n, 0, 0)),
                pl.BlockSpec((COUT, K), lambda n: (0, 0)),
                pl.BlockSpec((COUT, 1), lambda n: (0, 0)),
            ],
            out_specs=pl.BlockSpec((1, COUT, MP), lambda n: (n, 0, 0)),
            scratch_shapes=[pltpu.VMEM((K, MP), jnp.float32)],
        ),
        compiler_params=pltpu.CompilerParams(
            dimension_semantics=("parallel",)),
    )(x_flat, w2, b2)

    # Unpack: columns [0, H*WP) are (h, w') with w' in [0, WP); keep w' < W.
    # Result is already channel-major -> NCHW with no transpose.
    y = out[:, :, :H * WP].reshape(N, COUT, H, WP)[..., :W]
    return y


def reference_forward(x_nchw, weight_oihw, bias, he_val):
    y = jax.lax.conv_general_dilated(
        x_nchw, weight_oihw, window_strides=(1, 1), padding="SAME",
        dimension_numbers=("NCHW", "OIHW", "NCHW"))
    y = y + bias.reshape(1, -1, 1, 1)
    return y * he_val


if __name__ == "__main__":
    key = jax.random.PRNGKey(0)
    N, Cin, H, W = 2, 4, 16, 16
    Cout, KH, KW = 8, 3, 3
    lrmult = 1.0

    kx, kw = jax.random.split(key)
    x = jax.random.normal(kx, (N, Cin, H, W), dtype=jnp.float32)

    # __init__: weight ~ N(0,1) / lrmult; bias = 0; he_val = sqrt(2 / fan_in)
    weight = jax.random.normal(kw, (Cout, Cin, KH, KW), dtype=jnp.float32) / lrmult
    bias = jnp.zeros((Cout,), dtype=jnp.float32)
    he_val = math.sqrt(2.0 / (Cin * KH * KW))

    out = equalized_conv2d(x, weight, bias, he_val=he_val)
    out = jax.block_until_ready(out)

    ref = reference_forward(x, weight, bias, he_val)
    assert out.shape == (N, Cout, H, W)
    # Tolerance loosened vs the f32 version: MXU operands are bf16
    # (f32 accumulation keeps the error well inside 5e-2 at K=36).
    assert jnp.allclose(out, ref, atol=5e-2, rtol=5e-2), "mismatch vs reference"

    print("KERNEL_OK")
</pallas_src>

<mosaic_0001>
module attributes {stable_mosaic.version = 11 : i64} {
  func.func @kernel(%arg0: i32, %arg1: memref<1x4x512xf32, #tpu.memory_space<vmem>>, %arg2: memref<8x36xbf16, #tpu.memory_space<vmem>>, %arg3: memref<8x1xf32, #tpu.memory_space<vmem>>, %arg4: memref<1x8x384xf32, #tpu.memory_space<vmem>>, %arg5: memref<36x384xf32, #tpu.memory_space<vmem>>) attributes {dimension_semantics = [#tpu.dimension_semantics<parallel>], iteration_bounds = array<i64: 2>, scalar_prefetch = 0 : i64, scratch_operands = 1 : i64, tpu.core_type = #tpu.core_type<tc>, window_params = [{transform_indices = @transform_0, window_bounds = array<i64: 1, 4, 512>}, {pipeline_mode = #tpu.pipeline_mode<synchronous>, transform_indices = @transform_1, window_bounds = array<i64: 8, 36>}, {pipeline_mode = #tpu.pipeline_mode<synchronous>, transform_indices = @transform_2, window_bounds = array<i64: 8, 1>}, {transform_indices = @transform_3, window_bounds = array<i64: 1, 8, 384>}]} {
    %c0 = arith.constant 0 : index
    %c0_0 = arith.constant 0 : index
    %c0_1 = arith.constant 0 : index
    %0 = vector.load %arg1[%c0, %c0_0, %c0_1] : memref<1x4x512xf32, #tpu.memory_space<vmem>>, vector<1x1x384xf32>
    %1 = vector.shape_cast %0 : vector<1x1x384xf32> to vector<1x384xf32>
    %c0_2 = arith.constant 0 : index
    %c0_3 = arith.constant 0 : index
    %2 = vector.load %arg5[%c0_2, %c0_3] : memref<36x384xf32, #tpu.memory_space<vmem>>, vector<1x384xf32>
    tpu.vector_store %arg5[%c0_2, %c0_3], %1 {strides = array<i32>} : memref<36x384xf32, #tpu.memory_space<vmem>>, vector<1x384xf32>,
    %c0_4 = arith.constant 0 : index
    %c0_5 = arith.constant 0 : index
    %c1 = arith.constant 1 : index
    %3 = vector.load %arg1[%c0_4, %c0_5, %c1] : memref<1x4x512xf32, #tpu.memory_space<vmem>>, vector<1x1x384xf32>
    %4 = vector.shape_cast %3 : vector<1x1x384xf32> to vector<1x384xf32>
    %c1_6 = arith.constant 1 : index
    %c0_7 = arith.constant 0 : index
    %5 = vector.load %arg5[%c1_6, %c0_7] : memref<36x384xf32, #tpu.memory_space<vmem>>, vector<1x384xf32>
    tpu.vector_store %arg5[%c1_6, %c0_7], %4 {strides = array<i32>} : memref<36x384xf32, #tpu.memory_space<vmem>>, vector<1x384xf32>,
    %c0_8 = arith.constant 0 : index
    %c0_9 = arith.constant 0 : index
    %c2 = arith.constant 2 : index
    %6 = vector.load %arg1[%c0_8, %c0_9, %c2] : memref<1x4x512xf32, #tpu.memory_space<vmem>>, vector<1x1x384xf32>
    %7 = vector.shape_cast %6 : vector<1x1x384xf32> to vector<1x384xf32>
    %c2_10 = arith.constant 2 : index
    %c0_11 = arith.constant 0 : index
    %8 = vector.load %arg5[%c2_10, %c0_11] : memref<36x384xf32, #tpu.memory_space<vmem>>, vector<1x384xf32>
    tpu.vector_store %arg5[%c2_10, %c0_11], %7 {strides = array<i32>} : memref<36x384xf32, #tpu.memory_space<vmem>>, vector<1x384xf32>,
    %c0_12 = arith.constant 0 : index
    %c0_13 = arith.constant 0 : index
    %c18 = arith.constant 18 : index
    %9 = vector.load %arg1[%c0_12, %c0_13, %c18] : memref<1x4x512xf32, #tpu.memory_space<vmem>>, vector<1x1x384xf32>
    %10 = vector.shape_cast %9 : vector<1x1x384xf32> to vector<1x384xf32>
    %c3 = arith.constant 3 : index
    %c0_14 = arith.constant 0 : index
    %11 = vector.load %arg5[%c3, %c0_14] : memref<36x384xf32, #tpu.memory_space<vmem>>, vector<1x384xf32>
    tpu.vector_store %arg5[%c3, %c0_14], %10 {strides = array<i32>} : memref<36x384xf32, #tpu.memory_space<vmem>>, vector<1x384xf32>,
    %c0_15 = arith.constant 0 : index
    %c0_16 = arith.constant 0 : index
    %c19 = arith.constant 19 : index
    %12 = vector.load %arg1[%c0_15, %c0_16, %c19] : memref<1x4x512xf32, #tpu.memory_space<vmem>>, vector<1x1x384xf32>
    %13 = vector.shape_cast %12 : vector<1x1x384xf32> to vector<1x384xf32>
    %c4 = arith.constant 4 : index
    %c0_17 = arith.constant 0 : index
    %14 = vector.load %arg5[%c4, %c0_17] : memref<36x384xf32, #tpu.memory_space<vmem>>, vector<1x384xf32>
    tpu.vector_store %arg5[%c4, %c0_17], %13 {strides = array<i32>} : memref<36x384xf32, #tpu.memory_space<vmem>>, vector<1x384xf32>,
    %c0_18 = arith.constant 0 : index
    %c0_19 = arith.constant 0 : index
    %c20 = arith.constant 20 : index
    %15 = vector.load %arg1[%c0_18, %c0_19, %c20] : memref<1x4x512xf32, #tpu.memory_space<vmem>>, vector<1x1x384xf32>
    %16 = vector.shape_cast %15 : vector<1x1x384xf32> to vector<1x384xf32>
    %c5 = arith.constant 5 : index
    %c0_20 = arith.constant 0 : index
    %17 = vector.load %arg5[%c5, %c0_20] : memref<36x384xf32, #tpu.memory_space<vmem>>, vector<1x384xf32>
    tpu.vector_store %arg5[%c5, %c0_20], %16 {strides = array<i32>} : memref<36x384xf32, #tpu.memory_space<vmem>>, vector<1x384xf32>,
    %c0_21 = arith.constant 0 : index
    %c0_22 = arith.constant 0 : index
    %c36 = arith.constant 36 : index
    %18 = vector.load %arg1[%c0_21, %c0_22, %c36] : memref<1x4x512xf32, #tpu.memory_space<vmem>>, vector<1x1x384xf32>
    %19 = vector.shape_cast %18 : vector<1x1x384xf32> to vector<1x384xf32>
    %c6 = arith.constant 6 : index
    %c0_23 = arith.constant 0 : index
    %20 = vector.load %arg5[%c6, %c0_23] : memref<36x384xf32, #tpu.memory_space<vmem>>, vector<1x384xf32>
    tpu.vector_store %arg5[%c6, %c0_23], %19 {strides = array<i32>} : memref<36x384xf32, #tpu.memory_space<vmem>>, vector<1x384xf32>,
    %c0_24 = arith.constant 0 : index
    %c0_25 = arith.constant 0 : index
    %c37 = arith.constant 37 : index
    %21 = vector.load %arg1[%c0_24, %c0_25, %c37] : memref<1x4x512xf32, #tpu.memory_space<vmem>>, vector<1x1x384xf32>
    %22 = vector.shape_cast %21 : vector<1x1x384xf32> to vector<1x384xf32>
    %c7 = arith.constant 7 : index
    %c0_26 = arith.constant 0 : index
    %23 = vector.load %arg5[%c7, %c0_26] : memref<36x384xf32, #tpu.memory_space<vmem>>, vector<1x384xf32>
    tpu.vector_store %arg5[%c7, %c0_26], %22 {strides = array<i32>} : memref<36x384xf32, #tpu.memory_space<vmem>>, vector<1x384xf32>,
    %c0_27 = arith.constant 0 : index
    %c0_28 = arith.constant 0 : index
    %c38 = arith.constant 38 : index
    %24 = vector.load %arg1[%c0_27, %c0_28, %c38] : memref<1x4x512xf32, #tpu.memory_space<vmem>>, vector<1x1x384xf32>
    %25 = vector.shape_cast %24 : vector<1x1x384xf32> to vector<1x384xf32>
    %c8 = arith.constant 8 : index
    %c0_29 = arith.constant 0 : index
    %26 = vector.load %arg5[%c8, %c0_29] : memref<36x384xf32, #tpu.memory_space<vmem>>, vector<1x384xf32>
    tpu.vector_store %arg5[%c8, %c0_29], %25 {strides = array<i32>} : memref<36x384xf32, #tpu.memory_space<vmem>>, vector<1x384xf32>,
    %c0_30 = arith.constant 0 : index
    %c1_31 = arith.constant 1 : index
    %c0_32 = arith.constant 0 : index
    %27 = vector.load %arg1[%c0_30, %c1_31, %c0_32] : memref<1x4x512xf32, #tpu.memory_space<vmem>>, vector<1x1x384xf32>
    %28 = vector.shape_cast %27 : vector<1x1x384xf32> to vector<1x384xf32>
    %c9 = arith.constant 9 : index
    %c0_33 = arith.constant 0 : index
    %29 = vector.load %arg5[%c9, %c0_33] : memref<36x384xf32, #tpu.memory_space<vmem>>, vector<1x384xf32>
    tpu.vector_store %arg5[%c9, %c0_33], %28 {strides = array<i32>} : memref<36x384xf32, #tpu.memory_space<vmem>>, vector<1x384xf32>,
    %c0_34 = arith.constant 0 : index
    %c1_35 = arith.constant 1 : index
    %c1_36 = arith.constant 1 : index
    %30 = vector.load %arg1[%c0_34, %c1_35, %c1_36] : memref<1x4x512xf32, #tpu.memory_space<vmem>>, vector<1x1x384xf32>
    %31 = vector.shape_cast %30 : vector<1x1x384xf32> to vector<1x384xf32>
    %c10 = arith.constant 10 : index
    %c0_37 = arith.constant 0 : index
    %32 = vector.load %arg5[%c10, %c0_37] : memref<36x384xf32, #tpu.memory_space<vmem>>, vector<1x384xf32>
    tpu.vector_store %arg5[%c10, %c0_37], %31 {strides = array<i32>} : memref<36x384xf32, #tpu.memory_space<vmem>>, vector<1x384xf32>,
    %c0_38 = arith.constant 0 : index
    %c1_39 = arith.constant 1 : index
    %c2_40 = arith.constant 2 : index
    %33 = vector.load %arg1[%c0_38, %c1_39, %c2_40] : memref<1x4x512xf32, #tpu.memory_space<vmem>>, vector<1x1x384xf32>
    %34 = vector.shape_cast %33 : vector<1x1x384xf32> to vector<1x384xf32>
    %c11 = arith.constant 11 : index
    %c0_41 = arith.constant 0 : index
    %35 = vector.load %arg5[%c11, %c0_41] : memref<36x384xf32, #tpu.memory_space<vmem>>, vector<1x384xf32>
    tpu.vector_store %arg5[%c11, %c0_41], %34 {strides = array<i32>} : memref<36x384xf32, #tpu.memory_space<vmem>>, vector<1x384xf32>,
    %c0_42 = arith.constant 0 : index
    %c1_43 = arith.constant 1 : index
    %c18_44 = arith.constant 18 : index
    %36 = vector.load %arg1[%c0_42, %c1_43, %c18_44] : memref<1x4x512xf32, #tpu.memory_space<vmem>>, vector<1x1x384xf32>
    %37 = vector.shape_cast %36 : vector<1x1x384xf32> to vector<1x384xf32>
    %c12 = arith.constant 12 : index
    %c0_45 = arith.constant 0 : index
    %38 = vector.load %arg5[%c12, %c0_45] : memref<36x384xf32, #tpu.memory_space<vmem>>, vector<1x384xf32>
    tpu.vector_store %arg5[%c12, %c0_45], %37 {strides = array<i32>} : memref<36x384xf32, #tpu.memory_space<vmem>>, vector<1x384xf32>,
    %c0_46 = arith.constant 0 : index
    %c1_47 = arith.constant 1 : index
    %c19_48 = arith.constant 19 : index
    %39 = vector.load %arg1[%c0_46, %c1_47, %c19_48] : memref<1x4x512xf32, #tpu.memory_space<vmem>>, vector<1x1x384xf32>
    %40 = vector.shape_cast %39 : vector<1x1x384xf32> to vector<1x384xf32>
    %c13 = arith.constant 13 : index
    %c0_49 = arith.constant 0 : index
    %41 = vector.load %arg5[%c13, %c0_49] : memref<36x384xf32, #tpu.memory_space<vmem>>, vector<1x384xf32>
    tpu.vector_store %arg5[%c13, %c0_49], %40 {strides = array<i32>} : memref<36x384xf32, #tpu.memory_space<vmem>>, vector<1x384xf32>,
    %c0_50 = arith.constant 0 : index
    %c1_51 = arith.constant 1 : index
    %c20_52 = arith.constant 20 : index
    %42 = vector.load %arg1[%c0_50, %c1_51, %c20_52] : memref<1x4x512xf32, #tpu.memory_space<vmem>>, vector<1x1x384xf32>
    %43 = vector.shape_cast %42 : vector<1x1x384xf32> to vector<1x384xf32>
    %c14 = arith.constant 14 : index
    %c0_53 = arith.constant 0 : index
    %44 = vector.load %arg5[%c14, %c0_53] : memref<36x384xf32, #tpu.memory_space<vmem>>, vector<1x384xf32>
    tpu.vector_store %arg5[%c14, %c0_53], %43 {strides = array<i32>} : memref<36x384xf32, #tpu.memory_space<vmem>>, vector<1x384xf32>,
    %c0_54 = arith.constant 0 : index
    %c1_55 = arith.constant 1 : index
    %c36_56 = arith.constant 36 : index
    %45 = vector.load %arg1[%c0_54, %c1_55, %c36_56] : memref<1x4x512xf32, #tpu.memory_space<vmem>>, vector<1x1x384xf32>
    %46 = vector.shape_cast %45 : vector<1x1x384xf32> to vector<1x384xf32>
    %c15 = arith.constant 15 : index
    %c0_57 = arith.constant 0 : index
    %47 = vector.load %arg5[%c15, %c0_57] : memref<36x384xf32, #tpu.memory_space<vmem>>, vector<1x384xf32>
    tpu.vector_store %arg5[%c15, %c0_57], %46 {strides = array<i32>} : memref<36x384xf32, #tpu.memory_space<vmem>>, vector<1x384xf32>,
    %c0_58 = arith.constant 0 : index
    %c1_59 = arith.constant 1 : index
    %c37_60 = arith.constant 37 : index
    %48 = vector.load %arg1[%c0_58, %c1_59, %c37_60] : memref<1x4x512xf32, #tpu.memory_space<vmem>>, vector<1x1x384xf32>
    %49 = vector.shape_cast %48 : vector<1x1x384xf32> to vector<1x384xf32>
    %c16 = arith.constant 16 : index
    %c0_61 = arith.constant 0 : index
    %50 = vector.load %arg5[%c16, %c0_61] : memref<36x384xf32, #tpu.memory_space<vmem>>, vector<1x384xf32>
    tpu.vector_store %arg5[%c16, %c0_61], %49 {strides = array<i32>} : memref<36x384xf32, #tpu.memory_space<vmem>>, vector<1x384xf32>,
    %c0_62 = arith.constant 0 : index
    %c1_63 = arith.constant 1 : index
    %c38_64 = arith.constant 38 : index
    %51 = vector.load %arg1[%c0_62, %c1_63, %c38_64] : memref<1x4x512xf32, #tpu.memory_space<vmem>>, vector<1x1x384xf32>
    %52 = vector.shape_cast %51 : vector<1x1x384xf32> to vector<1x384xf32>
    %c17 = arith.constant 17 : index
    %c0_65 = arith.constant 0 : index
    %53 = vector.load %arg5[%c17, %c0_65] : memref<36x384xf32, #tpu.memory_space<vmem>>, vector<1x384xf32>
    tpu.vector_store %arg5[%c17, %c0_65], %52 {strides = array<i32>} : memref<36x384xf32, #tpu.memory_space<vmem>>, vector<1x384xf32>,
    %c0_66 = arith.constant 0 : index
    %c2_67 = arith.constant 2 : index
    %c0_68 = arith.constant 0 : index
    %54 = vector.load %arg1[%c0_66, %c2_67, %c0_68] : memref<1x4x512xf32, #tpu.memory_space<vmem>>, vector<1x1x384xf32>
    %55 = vector.shape_cast %54 : vector<1x1x384xf32> to vector<1x384xf32>
    %c18_69 = arith.constant 18 : index
    %c0_70 = arith.constant 0 : index
    %56 = vector.load %arg5[%c18_69, %c0_70] : memref<36x384xf32, #tpu.memory_space<vmem>>, vector<1x384xf32>
    tpu.vector_store %arg5[%c18_69, %c0_70], %55 {strides = array<i32>} : memref<36x384xf32, #tpu.memory_space<vmem>>, vector<1x384xf32>,
    %c0_71 = arith.constant 0 : index
    %c2_72 = arith.constant 2 : index
    %c1_73 = arith.constant 1 : index
    %57 = vector.load %arg1[%c0_71, %c2_72, %c1_73] : memref<1x4x512xf32, #tpu.memory_space<vmem>>, vector<1x1x384xf32>
    %58 = vector.shape_cast %57 : vector<1x1x384xf32> to vector<1x384xf32>
    %c19_74 = arith.constant 19 : index
    %c0_75 = arith.constant 0 : index
    %59 = vector.load %arg5[%c19_74, %c0_75] : memref<36x384xf32, #tpu.memory_space<vmem>>, vector<1x384xf32>
    tpu.vector_store %arg5[%c19_74, %c0_75], %58 {strides = array<i32>} : memref<36x384xf32, #tpu.memory_space<vmem>>, vector<1x384xf32>,
    %c0_76 = arith.constant 0 : index
    %c2_77 = arith.constant 2 : index
    %c2_78 = arith.constant 2 : index
    %60 = vector.load %arg1[%c0_76, %c2_77, %c2_78] : memref<1x4x512xf32, #tpu.memory_space<vmem>>, vector<1x1x384xf32>
    %61 = vector.shape_cast %60 : vector<1x1x384xf32> to vector<1x384xf32>
    %c20_79 = arith.constant 20 : index
    %c0_80 = arith.constant 0 : index
    %62 = vector.load %arg5[%c20_79, %c0_80] : memref<36x384xf32, #tpu.memory_space<vmem>>, vector<1x384xf32>
    tpu.vector_store %arg5[%c20_79, %c0_80], %61 {strides = array<i32>} : memref<36x384xf32, #tpu.memory_space<vmem>>, vector<1x384xf32>,
    %c0_81 = arith.constant 0 : index
    %c2_82 = arith.constant 2 : index
    %c18_83 = arith.constant 18 : index
    %63 = vector.load %arg1[%c0_81, %c2_82, %c18_83] : memref<1x4x512xf32, #tpu.memory_space<vmem>>, vector<1x1x384xf32>
    %64 = vector.shape_cast %63 : vector<1x1x384xf32> to vector<1x384xf32>
    %c21 = arith.constant 21 : index
    %c0_84 = arith.constant 0 : index
    %65 = vector.load %arg5[%c21, %c0_84] : memref<36x384xf32, #tpu.memory_space<vmem>>, vector<1x384xf32>
    tpu.vector_store %arg5[%c21, %c0_84], %64 {strides = array<i32>} : memref<36x384xf32, #tpu.memory_space<vmem>>, vector<1x384xf32>,
    %c0_85 = arith.constant 0 : index
    %c2_86 = arith.constant 2 : index
    %c19_87 = arith.constant 19 : index
    %66 = vector.load %arg1[%c0_85, %c2_86, %c19_87] : memref<1x4x512xf32, #tpu.memory_space<vmem>>, vector<1x1x384xf32>
    %67 = vector.shape_cast %66 : vector<1x1x384xf32> to vector<1x384xf32>
    %c22 = arith.constant 22 : index
    %c0_88 = arith.constant 0 : index
    %68 = vector.load %arg5[%c22, %c0_88] : memref<36x384xf32, #tpu.memory_space<vmem>>, vector<1x384xf32>
    tpu.vector_store %arg5[%c22, %c0_88], %67 {strides = array<i32>} : memref<36x384xf32, #tpu.memory_space<vmem>>, vector<1x384xf32>,
    %c0_89 = arith.constant 0 : index
    %c2_90 = arith.constant 2 : index
    %c20_91 = arith.constant 20 : index
    %69 = vector.load %arg1[%c0_89, %c2_90, %c20_91] : memref<1x4x512xf32, #tpu.memory_space<vmem>>, vector<1x1x384xf32>
    %70 = vector.shape_cast %69 : vector<1x1x384xf32> to vector<1x384xf32>
    %c23 = arith.constant 23 : index
    %c0_92 = arith.constant 0 : index
    %71 = vector.load %arg5[%c23, %c0_92] : memref<36x384xf32, #tpu.memory_space<vmem>>, vector<1x384xf32>
    tpu.vector_store %arg5[%c23, %c0_92], %70 {strides = array<i32>} : memref<36x384xf32, #tpu.memory_space<vmem>>, vector<1x384xf32>,
    %c0_93 = arith.constant 0 : index
    %c2_94 = arith.constant 2 : index
    %c36_95 = arith.constant 36 : index
    %72 = vector.load %arg1[%c0_93, %c2_94, %c36_95] : memref<1x4x512xf32, #tpu.memory_space<vmem>>, vector<1x1x384xf32>
    %73 = vector.shape_cast %72 : vector<1x1x384xf32> to vector<1x384xf32>
    %c24 = arith.constant 24 : index
    %c0_96 = arith.constant 0 : index
    %74 = vector.load %arg5[%c24, %c0_96] : memref<36x384xf32, #tpu.memory_space<vmem>>, vector<1x384xf32>
    tpu.vector_store %arg5[%c24, %c0_96], %73 {strides = array<i32>} : memref<36x384xf32, #tpu.memory_space<vmem>>, vector<1x384xf32>,
    %c0_97 = arith.constant 0 : index
    %c2_98 = arith.constant 2 : index
    %c37_99 = arith.constant 37 : index
    %75 = vector.load %arg1[%c0_97, %c2_98, %c37_99] : memref<1x4x512xf32, #tpu.memory_space<vmem>>, vector<1x1x384xf32>
    %76 = vector.shape_cast %75 : vector<1x1x384xf32> to vector<1x384xf32>
    %c25 = arith.constant 25 : index
    %c0_100 = arith.constant 0 : index
    %77 = vector.load %arg5[%c25, %c0_100] : memref<36x384xf32, #tpu.memory_space<vmem>>, vector<1x384xf32>
    tpu.vector_store %arg5[%c25, %c0_100], %76 {strides = array<i32>} : memref<36x384xf32, #tpu.memory_space<vmem>>, vector<1x384xf32>,
    %c0_101 = arith.constant 0 : index
    %c2_102 = arith.constant 2 : index
    %c38_103 = arith.constant 38 : index
    %78 = vector.load %arg1[%c0_101, %c2_102, %c38_103] : memref<1x4x512xf32, #tpu.memory_space<vmem>>, vector<1x1x384xf32>
    %79 = vector.shape_cast %78 : vector<1x1x384xf32> to vector<1x384xf32>
    %c26 = arith.constant 26 : index
    %c0_104 = arith.constant 0 : index
    %80 = vector.load %arg5[%c26, %c0_104] : memref<36x384xf32, #tpu.memory_space<vmem>>, vector<1x384xf32>
    tpu.vector_store %arg5[%c26, %c0_104], %79 {strides = array<i32>} : memref<36x384xf32, #tpu.memory_space<vmem>>, vector<1x384xf32>,
    %c0_105 = arith.constant 0 : index
    %c3_106 = arith.constant 3 : index
    %c0_107 = arith.constant 0 : index
    %81 = vector.load %arg1[%c0_105, %c3_106, %c0_107] : memref<1x4x512xf32, #tpu.memory_space<vmem>>, vector<1x1x384xf32>
    %82 = vector.shape_cast %81 : vector<1x1x384xf32> to vector<1x384xf32>
    %c27 = arith.constant 27 : index
    %c0_108 = arith.constant 0 : index
    %83 = vector.load %arg5[%c27, %c0_108] : memref<36x384xf32, #tpu.memory_space<vmem>>, vector<1x384xf32>
    tpu.vector_store %arg5[%c27, %c0_108], %82 {strides = array<i32>} : memref<36x384xf32, #tpu.memory_space<vmem>>, vector<1x384xf32>,
    %c0_109 = arith.constant 0 : index
    %c3_110 = arith.constant 3 : index
    %c1_111 = arith.constant 1 : index
    %84 = vector.load %arg1[%c0_109, %c3_110, %c1_111] : memref<1x4x512xf32, #tpu.memory_space<vmem>>, vector<1x1x384xf32>
    %85 = vector.shape_cast %84 : vector<1x1x384xf32> to vector<1x384xf32>
    %c28 = arith.constant 28 : index
    %c0_112 = arith.constant 0 : index
    %86 = vector.load %arg5[%c28, %c0_112] : memref<36x384xf32, #tpu.memory_space<vmem>>, vector<1x384xf32>
    tpu.vector_store %arg5[%c28, %c0_112], %85 {strides = array<i32>} : memref<36x384xf32, #tpu.memory_space<vmem>>, vector<1x384xf32>,
    %c0_113 = arith.constant 0 : index
    %c3_114 = arith.constant 3 : index
    %c2_115 = arith.constant 2 : index
    %87 = vector.load %arg1[%c0_113, %c3_114, %c2_115] : memref<1x4x512xf32, #tpu.memory_space<vmem>>, vector<1x1x384xf32>
    %88 = vector.shape_cast %87 : vector<1x1x384xf32> to vector<1x384xf32>
    %c29 = arith.constant 29 : index
    %c0_116 = arith.constant 0 : index
    %89 = vector.load %arg5[%c29, %c0_116] : memref<36x384xf32, #tpu.memory_space<vmem>>, vector<1x384xf32>
    tpu.vector_store %arg5[%c29, %c0_116], %88 {strides = array<i32>} : memref<36x384xf32, #tpu.memory_space<vmem>>, vector<1x384xf32>,
    %c0_117 = arith.constant 0 : index
    %c3_118 = arith.constant 3 : index
    %c18_119 = arith.constant 18 : index
    %90 = vector.load %arg1[%c0_117, %c3_118, %c18_119] : memref<1x4x512xf32, #tpu.memory_space<vmem>>, vector<1x1x384xf32>
    %91 = vector.shape_cast %90 : vector<1x1x384xf32> to vector<1x384xf32>
    %c30 = arith.constant 30 : index
    %c0_120 = arith.constant 0 : index
    %92 = vector.load %arg5[%c30, %c0_120] : memref<36x384xf32, #tpu.memory_space<vmem>>, vector<1x384xf32>
    tpu.vector_store %arg5[%c30, %c0_120], %91 {strides = array<i32>} : memref<36x384xf32, #tpu.memory_space<vmem>>, vector<1x384xf32>,
    %c0_121 = arith.constant 0 : index
    %c3_122 = arith.constant 3 : index
    %c19_123 = arith.constant 19 : index
    %93 = vector.load %arg1[%c0_121, %c3_122, %c19_123] : memref<1x4x512xf32, #tpu.memory_space<vmem>>, vector<1x1x384xf32>
    %94 = vector.shape_cast %93 : vector<1x1x384xf32> to vector<1x384xf32>
    %c31 = arith.constant 31 : index
    %c0_124 = arith.constant 0 : index
    %95 = vector.load %arg5[%c31, %c0_124] : memref<36x384xf32, #tpu.memory_space<vmem>>, vector<1x384xf32>
    tpu.vector_store %arg5[%c31, %c0_124], %94 {strides = array<i32>} : memref<36x384xf32, #tpu.memory_space<vmem>>, vector<1x384xf32>,
    %c0_125 = arith.constant 0 : index
    %c3_126 = arith.constant 3 : index
    %c20_127 = arith.constant 20 : index
    %96 = vector.load %arg1[%c0_125, %c3_126, %c20_127] : memref<1x4x512xf32, #tpu.memory_space<vmem>>, vector<1x1x384xf32>
    %97 = vector.shape_cast %96 : vector<1x1x384xf32> to vector<1x384xf32>
    %c32 = arith.constant 32 : index
    %c0_128 = arith.constant 0 : index
    %98 = vector.load %arg5[%c32, %c0_128] : memref<36x384xf32, #tpu.memory_space<vmem>>, vector<1x384xf32>
    tpu.vector_store %arg5[%c32, %c0_128], %97 {strides = array<i32>} : memref<36x384xf32, #tpu.memory_space<vmem>>, vector<1x384xf32>,
    %c0_129 = arith.constant 0 : index
    %c3_130 = arith.constant 3 : index
    %c36_131 = arith.constant 36 : index
    %99 = vector.load %arg1[%c0_129, %c3_130, %c36_131] : memref<1x4x512xf32, #tpu.memory_space<vmem>>, vector<1x1x384xf32>
    %100 = vector.shape_cast %99 : vector<1x1x384xf32> to vector<1x384xf32>
    %c33 = arith.constant 33 : index
    %c0_132 = arith.constant 0 : index
    %101 = vector.load %arg5[%c33, %c0_132] : memref<36x384xf32, #tpu.memory_space<vmem>>, vector<1x384xf32>
    tpu.vector_store %arg5[%c33, %c0_132], %100 {strides = array<i32>} : memref<36x384xf32, #tpu.memory_space<vmem>>, vector<1x384xf32>,
    %c0_133 = arith.constant 0 : index
    %c3_134 = arith.constant 3 : index
    %c37_135 = arith.constant 37 : index
    %102 = vector.load %arg1[%c0_133, %c3_134, %c37_135] : memref<1x4x512xf32, #tpu.memory_space<vmem>>, vector<1x1x384xf32>
    %103 = vector.shape_cast %102 : vector<1x1x384xf32> to vector<1x384xf32>
    %c34 = arith.constant 34 : index
    %c0_136 = arith.constant 0 : index
    %104 = vector.load %arg5[%c34, %c0_136] : memref<36x384xf32, #tpu.memory_space<vmem>>, vector<1x384xf32>
    tpu.vector_store %arg5[%c34, %c0_136], %103 {strides = array<i32>} : memref<36x384xf32, #tpu.memory_space<vmem>>, vector<1x384xf32>,
    %c0_137 = arith.constant 0 : index
    %c3_138 = arith.constant 3 : index
    %c38_139 = arith.constant 38 : index
    %105 = vector.load %arg1[%c0_137, %c3_138, %c38_139] : memref<1x4x512xf32, #tpu.memory_space<vmem>>, vector<1x1x384xf32>
    %106 = vector.shape_cast %105 : vector<1x1x384xf32> to vector<1x384xf32>
    %c35 = arith.constant 35 : index
    %c0_140 = arith.constant 0 : index
    %107 = vector.load %arg5[%c35, %c0_140] : memref<36x384xf32, #tpu.memory_space<vmem>>, vector<1x384xf32>
    tpu.vector_store %arg5[%c35, %c0_140], %106 {strides = array<i32>} : memref<36x384xf32, #tpu.memory_space<vmem>>, vector<1x384xf32>,
    %c0_141 = arith.constant 0 : index
    %c0_142 = arith.constant 0 : index
    %108 = vector.load %arg2[%c0_141, %c0_142] : memref<8x36xbf16, #tpu.memory_space<vmem>>, vector<8x36xbf16>
    %c0_143 = arith.constant 0 : index
    %c0_144 = arith.constant 0 : index
    %109 = vector.load %arg5[%c0_143, %c0_144] : memref<36x384xf32, #tpu.memory_space<vmem>>, vector<36x384xf32>
    %110 = arith.truncf %109 : vector<36x384xf32> to vector<36x384xbf16>
    %cst = arith.constant dense<0.000000e+00> : vector<8x384xf32>
    %111 = tpu.matmul %108, %110, %cst {dimension_numbers = #tpu.dot_dimension_numbers<[1], [0], [0], [1], [0, 0, 1, 1], [], []>} : vector<8x36xbf16>, vector<36x384xbf16>, vector<8x384xf32> -> vector<8x384xf32>
    %c0_145 = arith.constant 0 : index
    %c0_146 = arith.constant 0 : index
    %112 = vector.load %arg3[%c0_145, %c0_146] : memref<8x1xf32, #tpu.memory_space<vmem>>, vector<8x1xf32>
    %113 = vector.broadcast %112 : vector<8x1xf32> to vector<8x384xf32>
    %114 = arith.addf %111, %113 : vector<8x384xf32>
    %c0_147 = arith.constant 0 : index
    %c0_148 = arith.constant 0 : index
    %c0_149 = arith.constant 0 : index
    %115 = vector.load %arg4[%c0_147, %c0_148, %c0_149] : memref<1x8x384xf32, #tpu.memory_space<vmem>>, vector<1x8x384xf32>
    %116 = vector.shape_cast %115 : vector<1x8x384xf32> to vector<8x384xf32>
    %117 = vector.shape_cast %114 : vector<8x384xf32> to vector<1x8x384xf32>
    tpu.vector_store %arg4[%c0_147, %c0_148, %c0_149], %117 {strides = array<i32>} : memref<1x8x384xf32, #tpu.memory_space<vmem>>, vector<1x8x384xf32>,
    return
  }
  func.func @transform_0(%arg0: i32) -> (i32, i32, i32) {
    %c0_i32 = arith.constant 0 : i32
    %c0_i32_0 = arith.constant 0 : i32
    %c0_i32_1 = arith.constant 0 : i32
    return %arg0, %c0_i32, %c0_i32_0 : i32, i32, i32
  }
  func.func @transform_1(%arg0: i32) -> (i32, i32) {
    %c0_i32 = arith.constant 0 : i32
    %c0_i32_0 = arith.constant 0 : i32
    %c0_i32_1 = arith.constant 0 : i32
    return %c0_i32, %c0_i32_0 : i32, i32
  }
  func.func @transform_2(%arg0: i32) -> (i32, i32) {
    %c0_i32 = arith.constant 0 : i32
    %c0_i32_0 = arith.constant 0 : i32
    %c0_i32_1 = arith.constant 0 : i32
    return %c0_i32, %c0_i32_0 : i32, i32
  }
  func.func @transform_3(%arg0: i32) -> (i32, i32, i32) {
    %c0_i32 = arith.constant 0 : i32
    %c0_i32_0 = arith.constant 0 : i32
    %c0_i32_1 = arith.constant 0 : i32
    return %arg0, %c0_i32, %c0_i32_0 : i32, i32, i32
  }
}

</mosaic_0001>

<bundles_post_ra>
// kernel: tpu_custom_call.1
= control target key start
LH: loop header
LB: loop body
LE: loop exit
PB: predicated region body
PF: predicated region fallthrough
CT: control target
= control target key end

     0   :  { %8 = vsyncpa [#allocation4], 0  ;;  %s1352_s0 = inlined_call_operand.hbm [shape: f32[2,4,512], index: 0, kind: input, shape index: {}]   ;;  %s1353_s1 = inlined_call_operand.vmem [shape: bf16[8,36], index: 1, kind: input, shape index: {}]   ;;  %s1354_s2 = inlined_call_operand.vmem [shape: f32[8,1], index: 2, kind: input, shape index: {}]   ;;  %s1355_s3 = inlined_call_operand.hbm [shape: f32[2,8,384], index: 3, kind: output, shape index: {}]  }
   0x1   :  { %10 = vsyncpa [#allocation4 + $0x1], 0 }
   0x2   :  { %11 = vsyncpa [#allocation5], 0 }
   0x3   :  { %13 = vsyncpa [#allocation5 + $0x1], 0  ;;  %s1002_s12 = smov 0   ;;  %s1004_s13 = smov 0  }
   0x4   :  { %s1006_s14 = smov 0   ;;  %s1008_s15 = smov 0  }
   0x5 LB: > { %s1023_s16 = sadd.s32 4294967295, %s967_s15   ;;  %s755_s17 = sadd.s32 4294967294, %s967_s15   ;;  %s967_s15 = sphi %s1008_s15, %s1372_s15   ;;  %s963_s14 = sphi %s1006_s14, %s1371_s14   ;;  %s959_s13 = sphi %s1004_s13, %s1370_s13   ;;  %s955_s12 = sphi %s1002_s12, %s1369_s12  }
   0x6   : > { %s1027_s18 = sadd.s32 1, %s967_s15   ;;  %s26_s19 = sadd.s32 1, %s963_s14 }
   0x7   : > { %s23_s20 = ssub.s32 %s967_s15, %s1027_s18  ;;  %p33_p0 = scmp.ne.s32.totalorder %s963_s14, %s959_s13 }
   0x8   : > { %p24_p1 = scmp.eq.s32.totalorder %s23_s20, 0  ;;  %p34_p2 = scmp.eq.s32.totalorder %s967_s15, 0 }
   0x9   : > { %p39_p3 = scmp.ne.s32.totalorder %s959_s13, %s955_s12  ;;  %p40_p4 = scmp.eq.s32.totalorder %s1023_s16, 0 }
   0xa   : > { %s1039_s21 = scalar_select %p24_p1, %s963_s14, %s26_s19  }
   0xb   : > { %p1041_p5 = por %p34_p2, %p33_p0  ;;  %p1045_p6 = por %p40_p4, %p39_p3 }
   0xc   : > { %p105_p7 = scmp.eq.s32.totalorder %s1023_s16, 1  ;;  %p111_p8 = scmp.eq.s32.totalorder %s755_s17, 1 }
   0xd   : > { %p825_p10 = scmp.lt.s32.totalorder %s967_s15, 2  ;;  %s137_s26 = sand.u32 1, %s963_s14  }
   0xe   : > { %p1052_p11 = por %p105_p7, %p33_p0  ;;  %p1056_p12 = por %p111_p8, %p39_p3 }
   0xf   : > { %s796_s27 = sshll.u32 %s967_s15, 8  ;;  %s758_s28 = sshll.u32 %s137_s26, 4 }
  0x10   : > { %s1359_s24 = scalar_select %p1052_p11, 1, 0 }
  0x11   : > { %s1360_s25 = scalar_select %p1056_p12, 1, 0 }
  0x12   : > { %s1065_s4 = scalar_lea.hbm %s1352_s0, %s796_s27  ;;  %s141_s5 = scalar_lea.vmem [#allocation3], %s758_s28 }
  0x13   : > { %s149_s6 = sshll.u32 %s141_s5, 4  ;;  %p1069_p13 = pnand %p825_p10, %p1041_p5  ;;  %s1073_s6 = int_to_ptr.vmem [resolvable:$true] %s149_s6 }
  0x14   : > { %s138_s8 = scalar_lea.sflag [#allocation4], %s137_s26  ;;  %s871_s9 = scalar_lea.hbm %s1065_s4, 256 }
  0x15   : > { %p872_p2 = scmp.ne.s32.totalorder %s1065_s4, %s871_s9  ;;  %p873_p3 = pneg %p1069_p13 }
  0x16   : > { %s876_s17 = scalar_lea.hbm %s1352_s0, 512  ;;  %p877_p5 = scmp.lt.u32.totalorder %s1065_s4, %s1352_s0 }
  0x17   : > { %p874_p4 = pnand %p873_p3, %p872_p2  ;;  %p878_p8 = scmp.lt.u32.totalorder %s876_s17, %s871_s9 }
  0x18   : > { %p880_p9 = scmp.lt.u32.totalorder %s871_s9, %s1065_s4 }
  0x19   : > { %p875_p7 = pneg %p874_p4  ;;  %p879_p10 = por %p878_p8, %p877_p5 }
  0x1b   : > { %p881_p0 = por %p880_p9, %p879_p10 }
  0x1d   : > { %p882_p1 = pnand %p881_p0, %p875_p7 }
  0x1f   : > { %885 = shalt.err (!%p882_p1)
}
  0x20   : > { %s886_s22 = scalar_lea.vmem %s1073_s6, 256  ;;  %s969_s26 = smov [#allocation3]  }
  0x21   : > { %p887_p2 = scmp.ne.s32.totalorder %s1073_s6, %s886_s22  ;;  %s891_s27 = sshll.u32 %s969_s26, 4  ;;  %s892_s27 = int_to_ptr.vmem [resolvable:$false] %s891_s27 }
  0x22   : > { %s893_s28 = scalar_lea.vmem %s892_s27, 512  ;;  %p894_p11 = scmp.lt.s32.totalorder %s1073_s6, %s892_s27 }
  0x23   : > { %p889_p4 = pnand %p887_p2, %p873_p3  ;;  %p895_p5 = scmp.lt.s32.totalorder %s893_s28, %s886_s22 }
  0x25   : > { %p890_p12 = pneg %p889_p4  ;;  %p896_p8 = por %p895_p5, %p894_p11 }
  0x27   : > { %p897_p9 = pnand %p896_p8, %p890_p12 }
  0x29   : > { %900 = shalt.err (!%p897_p9)
}
  0x2a   : > { %820 = dma.hbm_to_vmem [thread:$0]  (!%p1069_p13), %s1065_s4, 256, %s1073_s6, %s138_s8  }
  0x2b   : > { %p1362_p0 = scmp.lt.s32.totalorder %s967_s15, 3  ;;  %p1363_p1 = scmp.ge.s32.totalorder %s967_s15, 1 }
  0x2d   : > { %p155_p3 = pnand %p1363_p1, %p1362_p0 }
  0x2e   : > { %s1107_s29 = sand.u32 (!%p155_p3), 1, %s959_s13  }
  0x2f   : > { %158 = sbr.rel (%p155_p3) target bundleno = 478 (0x1de), region = 32  ;;  %s762_s30 = sshll.u32 (!%p155_p3), %s1107_s29, 4 }
  0x30   : > { %s161_s5 = scalar_lea.sflag (!%p155_p3), [#allocation4], %s1107_s29  ;;  %s1111_s9 = scalar_lea.vmem (!%p155_p3), [#allocation3], %s762_s30 }
  0x36   : > { %946 = dma.done.wait (%p1045_p6), %s161_s5, 256  }
  0x37   : > { %948 = vsyncadd (%p1045_p6), %s161_s5, 4294967040  ;;  %v217_v0 = vld [vmem:[%s1111_s9] ss:$4 sm:$0xf]  ;;  %s970_s4 = smov 110   ;;  %s971_s6 = smov 127   ;;  %v189_v8 = vlaneseq }
  0x38   : > { %v195_v1 = vld [vmem:[%s1111_s9] ss:$4 sm:$0xf]  ;;  %219 = vrot.lane.b32.xlu1 %v217_v0, %s970_s4  ;;  %s972_s23 = smov 109   ;;  %s973_s7 = smov 126   ;;  %v978_v18 = vmov 0.0  }
  0x39   : > { %197 = vrot.lane.b32.xlu0 %v195_v1, %s971_s6  ;;  %v228_v2 = vld [vmem:[%s1111_s9] ss:$4 sm:$0xf]  ;;  %s974_s8 = smov 92   ;;  %s975_s10 = smov 108   ;;  %vm1135_vm0 = vcmp.lt.s32.totalorder %v189_v8, 384  ;;  %801 = vmatprep.subr.bf16.mxu1 %v978_v18 }
  0x3a   : > { %v206_v3 = vld [vmem:[%s1111_s9] ss:$4 sm:$0xf]  ;;  %s976_s11 = smov 90   ;;  %s977_s17 = smov 91   ;;  %v979_v39 = vmov 0  }
  0x3b   : > { %v250_v4 = vld [vmem:[%s1111_s9] ss:$4 sm:$0xf]  ;;  %v765_v9 = vld [vmem:[%s1111_s9 + $0x1] ss:$4 sm:$0xf]  ;;  %618 = vmatprep.mubr.bf16.mxu0 %v979_v39  ;;  %870 = vset.pattern.permute.xlu0 %v979_v39 }
  0x3c   : > { %230 = vrot.lane.b32.xlu1 %v228_v2, %s972_s23  ;;  %v239_v5 = vld [vmem:[%s1111_s9] ss:$4 sm:$0xf]  ;;  %v764_v10 = vld [vmem:[%s1111_s9 + $0x1] ss:$4 sm:$0xf] }
  0x3d   : > { %208 = vrot.lane.b32.xlu0 %v206_v3, %s973_s7  ;;  %v272_v6 = vld [vmem:[%s1111_s9] ss:$4 sm:$0xf]  ;;  %v763_v13 = vld [vmem:[%s1111_s9 + $0x1] ss:$4 sm:$0x7] }
  0x3e   : > { %v261_v7 = vld [vmem:[%s1111_s9] ss:$4 sm:$0xf]  ;;  %v767_v14 = vld [vmem:[%s1111_s9 + $0x1] ss:$4 sm:$0xf] }
  0x3f   : > { %v188_v12 = vld [vmem:[%s1111_s9] ss:$4 sm:$0x7]  ;;  %v766_v15 = vld [vmem:[%s1111_s9 + $0x1] ss:$4 sm:$0xf] }
  0x40   : > { %252 = vrot.lane.b32.xlu1 %v250_v4, %s974_s8  ;;  %193 = vst.msk [vmem:[#allocation2] ss:$8 sm:$0x7] %vm1135_vm0, %v188_v12  ;;  %286 = vst.msk [vmem:[#allocation2 + $0x19] ss:$8 sm:$0x7] %vm1135_vm0, %v763_v13 }
  0x41   : > { %241 = vrot.lane.b32.xlu0 %v239_v5, %s975_s10  ;;  %v769_v16 = vld [vmem:[%s1111_s9 + $0x1] ss:$4 sm:$0xf]  ;;  %v774_v21 = vld [vmem:[%s1111_s9 + $0x2] ss:$4 sm:$0xf] }
  0x42   : > { %v768_v17 = vld [vmem:[%s1111_s9 + $0x1] ss:$4 sm:$0xf]  ;;  %v773_v22 = vld [vmem:[%s1111_s9 + $0x2] ss:$4 sm:$0xf] }
  0x43   : > { %v771_v19 = vld [vmem:[%s1111_s9 + $0x1] ss:$4 sm:$0xf]  ;;  %v772_v23 = vld [vmem:[%s1111_s9 + $0x2] ss:$4 sm:$0x7] }
  0x44   : > { %274 = vrot.lane.b32.xlu1 %v272_v6, %s976_s11  ;;  %v770_v20 = vld [vmem:[%s1111_s9 + $0x1] ss:$4 sm:$0xf]  ;;  %372 = vst.msk [vmem:[#allocation2 + $0x32] ss:$8 sm:$0x7] %vm1135_vm0, %v772_v23 }
  0x45   : > { %263 = vrot.lane.b32.xlu0 %v261_v7, %s977_s17  ;;  %v776_v24 = vld [vmem:[%s1111_s9 + $0x2] ss:$4 sm:$0xf]  ;;  %v781_v30 = vld [vmem:[%s1111_s9 + $0x3] ss:$4 sm:$0x7] }
  0x46   : > { %v775_v25 = vld [vmem:[%s1111_s9 + $0x2] ss:$4 sm:$0xf]  ;;  %458 = vst.msk [vmem:[#allocation2 + $0x4b] ss:$8 sm:$0x7] %vm1135_vm0, %v781_v30 }
  0x47   : > { %v778_v26 = vld [vmem:[%s1111_s9 + $0x2] ss:$4 sm:$0xf]  ;;  %v783_v31 = vld [vmem:[%s1111_s9 + $0x3] ss:$4 sm:$0xf] }
  0x48   : > { %301 = vrot.lane.b32.xlu1 %v765_v9, %s973_s7  ;;  %v777_v27 = vld [vmem:[%s1111_s9 + $0x2] ss:$4 sm:$0xf]  ;;  %v782_v32 = vld [vmem:[%s1111_s9 + $0x3] ss:$4 sm:$0xf] }
  0x49   : > { %291 = vrot.lane.b32.xlu0 %v764_v10, %s971_s6  ;;  %v780_v28 = vld [vmem:[%s1111_s9 + $0x2] ss:$4 sm:$0xf]  ;;  %v785_v33 = vld [vmem:[%s1111_s9 + $0x3] ss:$4 sm:$0xf] }
  0x4a   : > { %v779_v29 = vld [vmem:[%s1111_s9 + $0x2] ss:$4 sm:$0xf]  ;;  %v784_v34 = vld [vmem:[%s1111_s9 + $0x3] ss:$4 sm:$0xf] }
  0x4b   : > { %v787_v35 = vld [vmem:[%s1111_s9 + $0x3] ss:$4 sm:$0xf]  ;;  %vm980_vm1 = vmmov 0   ;;  %vm222_vm2 = vcmask 900096   ;;  %vm200_vm3 = vcmask 1039360  }
  0x4c   : > { %321 = vrot.lane.b32.xlu1 %v767_v14, %s972_s23  ;;  %v786_v36 = vld [vmem:[%s1111_s9 + $0x3] ss:$4 sm:$0xf]  ;;  %807 = vmatprep.mubr.msk.bf16.mxu1 %vm980_vm1, %v978_v18  ;;  %vm233_vm4 = vcmask 891904   ;;  %vm211_vm5 = vcmask 1031168   ;;  %vm255_vm6 = vcmask 752640  }
  0x4d   : > { %311 = vrot.lane.b32.xlu0 %v766_v15, %s970_s4  ;;  %v789_v37 = vld [vmem:[%s1111_s9 + $0x3] ss:$4 sm:$0xf]  ;;  %vm244_vm7 = vcmask 883712   ;;  %vm277_vm8 = vcmask 736256   ;;  %vm266_vm9 = vcmask 744448  }
  0x4e   : > { %v788_v38 = vld [vmem:[%s1111_s9 + $0x3] ss:$4 sm:$0xf]  ;;  %vm576_vm10 = vcmask 1041408   ;;  %vm572_vm11 = vcmask 293888   ;;  %s811_s27 = smul.u32 24, %s1107_s29 }
  0x4f   : > { %v566_v40 = vld [vmem:[%s1354_s2] sm:$0xff]  ;;  %s812_s28 = smul.u32 384, %s1023_s16  ;;  %s671_s16 = scalar_lea.sflag [#allocation5], %s1107_s29 }
  0x50   : > { %341 = vrot.lane.b32.xlu1 %v769_v16, %s974_s8  ;;  %s186_s30 = scalar_lea.vmem [#allocation6], %s811_s27  ;;  %p1366_p11 = scmp.ne.s32.totalorder %s1359_s24, 0 }
  0x51   : > { %331 = vrot.lane.b32.xlu0 %v768_v17, %s975_s10  ;;  %s685_s5 = sshll.u32 %s186_s30, 4  ;;  %s1310_s5 = int_to_ptr.vmem [resolvable:$true] %s685_s5 }
  0x54   : > { %361 = vrot.lane.b32.xlu1 %v771_v19, %s976_s11 }
  0x55   : > { %351 = vrot.lane.b32.xlu0 %v770_v20, %s977_s17 }
  0x58   : > { %387 = vrot.lane.b32.xlu1 %v774_v21, %s973_s7 }
  0x59   : > { %377 = vrot.lane.b32.xlu0 %v773_v22, %s971_s6 }
  0x5c   : > { %407 = vrot.lane.b32.xlu1 %v776_v24, %s972_s23 }
  0x5d   : > { %397 = vrot.lane.b32.xlu0 %v775_v25, %s970_s4 }
  0x60   : > { %427 = vrot.lane.b32.xlu1 %v778_v26, %s974_s8 }
  0x61   : > { %417 = vrot.lane.b32.xlu0 %v777_v27, %s975_s10 }
  0x64   : > { %447 = vrot.lane.b32.xlu1 %v780_v28, %s976_s11 }
  0x65   : > { %437 = vrot.lane.b32.xlu0 %v779_v29, %s977_s17 }
  0x68   : > { %473 = vrot.lane.b32.xlu1 %v783_v31, %s973_s7  ;;  %s981_s7 = smov [#allocation6]  }
  0x69   : > { %463 = vrot.lane.b32.xlu0 %v782_v32, %s971_s6  ;;  %s1308_s6 = scalar_lea.hbm %s1355_s3, %s812_s28 }
  0x6c   : > { %493 = vrot.lane.b32.xlu1 %v785_v33, %s972_s23  ;;  %s901_s23 = scalar_lea.vmem %s1310_s5, 384 }
  0x6d   : > { %483 = vrot.lane.b32.xlu0 %v784_v34, %s970_s4  ;;  %p902_p6 = scmp.ne.s32.totalorder %s1310_s5, %s901_s23 }
  0x6f   : > { %p903_p12 = pnand %p902_p6, %p1366_p11 }
  0x70   : > { %513 = vrot.lane.b32.xlu1 %v787_v35, %s974_s8  ;;  %s905_s8 = sshll.u32 %s981_s7, 4  ;;  %s906_s8 = int_to_ptr.vmem [resolvable:$false] %s905_s8 }
  0x71   : > { %503 = vrot.lane.b32.xlu0 %v786_v36, %s975_s10  ;;  %p904_p13 = pneg %p903_p12  ;;  %s907_s10 = scalar_lea.vmem %s906_s8, 768 }
  0x72   : > { %p908_p7 = scmp.lt.s32.totalorder %s1310_s5, %s906_s8  ;;  %p909_p10 = scmp.lt.s32.totalorder %s907_s10, %s901_s23 }
  0x74   : > { %533 = vrot.lane.b32.xlu1 %v789_v37, %s976_s11  ;;  %p910_p2 = por %p909_p10, %p908_p7 }
  0x75   : > { %523 = vrot.lane.b32.xlu0 %v788_v38, %s977_s17 }
  0x76   : > { %p911_p4 = pnand %p910_p2, %p904_p13 }
  0x79   : > { %569 = vperm.xlu0 %870, %v566_v40  }
  0xaa   : > { %v220_v41 = vpop.permute.xlu1 %219 }
  0xab   : > { %v198_v42 = vpop.permute.xlu0 %197  ;;  %v221_v43 = vrot.slane %v220_v41, 1 }
  0xac   : > { %v199_v44 = vrot.slane %v198_v42, 1 }
  0xad   : > { %v223_v45 = vsel %vm222_vm2, %v220_v41, %v221_v43 }
  0xae   : > { %v201_v46 = vsel %vm200_vm3, %v198_v42, %v199_v44  ;;  %226 = vst.msk [vmem:[#allocation2 + $0x3] ss:$8 sm:$0x7] %vm1135_vm0, %v223_v45  ;;  %v231_v47 = vpop.permute.xlu1 %230 }
  0xaf   : > { %204 = vst.msk [vmem:[#allocation2 + $0x1] ss:$8 sm:$0x7] %vm1135_vm0, %v201_v46  ;;  %v209_v48 = vpop.permute.xlu0 %208  ;;  %v232_v49 = vrot.slane %v231_v47, 1 }
  0xb0   : > { %v210_v50 = vrot.slane %v209_v48, 1 }
  0xb1   : > { %v234_v51 = vsel %vm233_vm4, %v231_v47, %v232_v49 }
  0xb2   : > { %v212_v52 = vsel %vm211_vm5, %v209_v48, %v210_v50  ;;  %237 = vst.msk [vmem:[#allocation2 + $0x4] ss:$8 sm:$0x7] %vm1135_vm0, %v234_v51  ;;  %v253_v53 = vpop.permute.xlu1 %252 }
  0xb3   : > { %215 = vst.msk [vmem:[#allocation2 + $0x2] ss:$8 sm:$0x7] %vm1135_vm0, %v212_v52  ;;  %v242_v54 = vpop.permute.xlu0 %241  ;;  %v254_v55 = vrot.slane %v253_v53, 1 }
  0xb4   : > { %v243_v56 = vrot.slane %v242_v54, 1 }
  0xb5   : > { %v256_v57 = vsel %vm255_vm6, %v253_v53, %v254_v55 }
  0xb6   : > { %v245_v58 = vsel %vm244_vm7, %v242_v54, %v243_v56  ;;  %259 = vst.msk [vmem:[#allocation2 + $0x6] ss:$8 sm:$0x7] %vm1135_vm0, %v256_v57  ;;  %v275_v59 = vpop.permute.xlu1 %274 }
  0xb7   : > { %248 = vst.msk [vmem:[#allocation2 + $0x5] ss:$8 sm:$0x7] %vm1135_vm0, %v245_v58  ;;  %v264_v60 = vpop.permute.xlu0 %263  ;;  %v276_v61 = vrot.slane %v275_v59, 1 }
  0xb8   : > { %v265_v62 = vrot.slane %v264_v60, 1 }
  0xb9   : > { %v278_v63 = vsel %vm277_vm8, %v275_v59, %v276_v61 }
  0xba   : > { %v267_v0 = vsel %vm266_vm9, %v264_v60, %v265_v62  ;;  %281 = vst.msk [vmem:[#allocation2 + $0x18] ss:$8 sm:$0x7] %vm1135_vm0, %v278_v63  ;;  %v302_v1 = vpop.permute.xlu1 %301 }
  0xbb   : > { %270 = vst.msk [vmem:[#allocation2 + $0x7] ss:$8 sm:$0x7] %vm1135_vm0, %v267_v0  ;;  %v292_v2 = vpop.permute.xlu0 %291  ;;  %v303_v3 = vrot.slane %v302_v1, 1 }
  0xbc   : > { %v293_v4 = vrot.slane %v292_v2, 1 }
  0xbd   : > { %v304_v5 = vsel %vm211_vm5, %v302_v1, %v303_v3 }
  0xbe   : > { %v294_v6 = vsel %vm200_vm3, %v292_v2, %v293_v4  ;;  %307 = vst.msk [vmem:[#allocation2 + $0x1b] ss:$8 sm:$0x7] %vm1135_vm0, %v304_v5  ;;  %v322_v7 = vpop.permute.xlu1 %321 }
  0xbf   : > { %297 = vst.msk [vmem:[#allocation2 + $0x1a] ss:$8 sm:$0x7] %vm1135_vm0, %v294_v6  ;;  %v312_v8 = vpop.permute.xlu0 %311  ;;  %v323_v9 = vrot.slane %v322_v7, 1 }
  0xc0   : > { %v313_v10 = vrot.slane %v312_v8, 1 }
  0xc1   : > { %v324_v12 = vsel %vm233_vm4, %v322_v7, %v323_v9 }
  0xc2   : > { %v314_v13 = vsel %vm222_vm2, %v312_v8, %v313_v10  ;;  %327 = vst.msk [vmem:[#allocation2 + $0x1d] ss:$8 sm:$0x7] %vm1135_vm0, %v324_v12  ;;  %v342_v14 = vpop.permute.xlu1 %341  ;;  %v543_v31 = vld [vmem:[#allocation2 + $0x8] sm:$0xff]  ;;  %v544_v32 = vld [vmem:[#allocation2 + $0x10] sm:$0xff]  ;;  %v542_v33 = vld [vmem:[#allocation2] sm:$0xff] }
  0xc3   : > { %317 = vst.msk [vmem:[#allocation2 + $0x1c] ss:$8 sm:$0x7] %vm1135_vm0, %v314_v13  ;;  %v332_v15 = vpop.permute.xlu0 %331  ;;  %v343_v16 = vrot.slane %v342_v14, 1 }
  0xc4   : > { %v333_v17 = vrot.slane %v332_v15, 1 }
  0xc5   : > { %v344_v19 = vsel %vm255_vm6, %v342_v14, %v343_v16 }
  0xc6   : > { %v334_v20 = vsel %vm244_vm7, %v332_v15, %v333_v17  ;;  %347 = vst.msk [vmem:[#allocation2 + $0x1f] ss:$8 sm:$0x7] %vm1135_vm0, %v344_v19  ;;  %v362_v21 = vpop.permute.xlu1 %361 }
  0xc7   : > { %337 = vst.msk [vmem:[#allocation2 + $0x1e] ss:$8 sm:$0x7] %vm1135_vm0, %v334_v20  ;;  %v352_v22 = vpop.permute.xlu0 %351  ;;  %v363_v23 = vrot.slane %v362_v21, 1 }
  0xc8   : > { %v353_v24 = vrot.slane %v352_v22, 1 }
  0xc9   : > { %v364_v25 = vsel %vm277_vm8, %v362_v21, %v363_v23 }
  0xca   : > { %v354_v26 = vsel %vm266_vm9, %v352_v22, %v353_v24  ;;  %367 = vst.msk [vmem:[#allocation2 + $0x31] ss:$8 sm:$0x7] %vm1135_vm0, %v364_v25  ;;  %v388_v27 = vpop.permute.xlu1 %387 }
  0xcb   : > { %357 = vst.msk [vmem:[#allocation2 + $0x30] ss:$8 sm:$0x7] %vm1135_vm0, %v354_v26  ;;  %v378_v28 = vpop.permute.xlu0 %377  ;;  %v389_v29 = vrot.slane %v388_v27, 1 }
  0xcc   : > { %v379_v30 = vrot.slane %v378_v28, 1 }
  0xcd   : > { %v390_v34 = vsel %vm211_vm5, %v388_v27, %v389_v29 }
  0xce   : > { %v380_v35 = vsel %vm200_vm3, %v378_v28, %v379_v30  ;;  %v546_v36 = vld [vmem:[#allocation2 + $0x20] sm:$0xff]  ;;  %v547_v37 = vld [vmem:[#allocation2 + $0x28] sm:$0xff]  ;;  %v545_v38 = vld [vmem:[#allocation2 + $0x18] sm:$0xff]  ;;  %393 = vst.msk [vmem:[#allocation2 + $0x34] ss:$8 sm:$0x7] %vm1135_vm0, %v390_v34  ;;  %v408_v39 = vpop.permute.xlu1 %407 }
  0xcf   : > { %383 = vst.msk [vmem:[#allocation2 + $0x33] ss:$8 sm:$0x7] %vm1135_vm0, %v380_v35  ;;  %v398_v40 = vpop.permute.xlu0 %397  ;;  %v558_v41 = vpack.c.bf16 %v546_v36, %v543_v31  ;;  %v559_v42 = vpack.c.bf16 %v547_v37, %v544_v32  ;;  %v557_v43 = vpack.c.bf16 %v545_v38, %v542_v33  ;;  %v409_v44 = vrot.slane %v408_v39, 1  ;;  %v541_v38 = vld [vmem:[%s1353_s1] sm:$0xf] }
  0xd0   : > { %v399_v45 = vrot.slane %v398_v40, 1 }
  0xd1   : > { %586 = vmatprep.subr.bf16.mxu0 %v558_v41  ;;  %802 = vmatpush3.bf16.msra.mxu1 %v559_v42  ;;  %v410_v46 = vsel %vm233_vm4, %v408_v39, %v409_v44 }
  0xd2   : > { %v400_v47 = vsel %vm222_vm2, %v398_v40, %v399_v45  ;;  %587 = vmatpush1.bf16.msra.mxu0 %v557_v43  ;;  %803 = vmatprep.subr.bf16.mxu1 %v978_v18  ;;  %413 = vst.msk [vmem:[#allocation2 + $0x36] ss:$8 sm:$0x7] %vm1135_vm0, %v410_v46  ;;  %v428_v48 = vpop.permute.xlu1 %427 }
  0xd3   : > { %403 = vst.msk [vmem:[#allocation2 + $0x35] ss:$8 sm:$0x7] %vm1135_vm0, %v400_v47  ;;  %v418_v49 = vpop.permute.xlu0 %417  ;;  %v429_v50 = vrot.slane %v428_v48, 1 }
  0xd4   : > { %v419_v51 = vrot.slane %v418_v49, 1 }
  0xd5   : > { %v430_v52 = vsel %vm255_vm6, %v428_v48, %v429_v50 }
  0xd6   : > { %v420_v53 = vsel %vm244_vm7, %v418_v49, %v419_v51  ;;  %433 = vst.msk [vmem:[#allocation2 + $0x48] ss:$8 sm:$0x7] %vm1135_vm0, %v430_v52  ;;  %v448_v54 = vpop.permute.xlu1 %447 }
  0xd7   : > { %423 = vst.msk [vmem:[#allocation2 + $0x37] ss:$8 sm:$0x7] %vm1135_vm0, %v420_v53  ;;  %v438_v55 = vpop.permute.xlu0 %437  ;;  %v449_v56 = vrot.slane %v448_v54, 1 }
  0xd8   : > { %v439_v57 = vrot.slane %v438_v55, 1 }
  0xd9   : > { %v450_v58 = vsel %vm277_vm8, %v448_v54, %v449_v56 }
  0xda   : > { %v440_v59 = vsel %vm266_vm9, %v438_v55, %v439_v57  ;;  %453 = vst.msk [vmem:[#allocation2 + $0x4a] ss:$8 sm:$0x7] %vm1135_vm0, %v450_v58  ;;  %v474_v60 = vpop.permute.xlu1 %473 }
  0xdb   : > { %443 = vst.msk [vmem:[#allocation2 + $0x49] ss:$8 sm:$0x7] %vm1135_vm0, %v440_v59  ;;  %v464_v61 = vpop.permute.xlu0 %463  ;;  %v475_v62 = vrot.slane %v474_v60, 1 }
  0xdc   : > { %v465_v63 = vrot.slane %v464_v61, 1 }
  0xdd   : > { %v476_v0 = vsel %vm211_vm5, %v474_v60, %v475_v62 }
  0xde   : > { %v466_v1 = vsel %vm200_vm3, %v464_v61, %v465_v63  ;;  %479 = vst.msk [vmem:[#allocation2 + $0x4d] ss:$8 sm:$0x7] %vm1135_vm0, %v476_v0  ;;  %v494_v2 = vpop.permute.xlu1 %493  ;;  %v549_v20 = vld [vmem:[#allocation2 + $0x38] sm:$0xff]  ;;  %v550_v21 = vld [vmem:[#allocation2 + $0x40] sm:$0xff]  ;;  %v548_v22 = vld [vmem:[#allocation2 + $0x30] sm:$0xff] }
  0xdf   : > { %469 = vst.msk [vmem:[#allocation2 + $0x4c] ss:$8 sm:$0x7] %vm1135_vm0, %v466_v1  ;;  %v484_v3 = vpop.permute.xlu0 %483  ;;  %v495_v4 = vrot.slane %v494_v2, 1 }
  0xe0   : > { %v485_v5 = vrot.slane %v484_v3, 1 }
  0xe1   : > { %v496_v6 = vsel %vm233_vm4, %v494_v2, %v495_v4 }
  0xe2   : > { %v486_v7 = vsel %vm222_vm2, %v484_v3, %v485_v5  ;;  %499 = vst.msk [vmem:[#allocation2 + $0x4f] ss:$8 sm:$0x7] %vm1135_vm0, %v496_v6  ;;  %v514_v8 = vpop.permute.xlu1 %513 }
  0xe3   : > { %489 = vst.msk [vmem:[#allocation2 + $0x4e] ss:$8 sm:$0x7] %vm1135_vm0, %v486_v7  ;;  %v504_v9 = vpop.permute.xlu0 %503  ;;  %v515_v10 = vrot.slane %v514_v8, 1 }
  0xe4   : > { %v505_v12 = vrot.slane %v504_v9, 1 }
  0xe5   : > { %v516_v13 = vsel %vm255_vm6, %v514_v8, %v515_v10 }
  0xe6   : > { %v506_v14 = vsel %vm244_vm7, %v504_v9, %v505_v12  ;;  %519 = vst.msk [vmem:[#allocation2 + $0x61] ss:$8 sm:$0x7] %vm1135_vm0, %v516_v13  ;;  %v534_v15 = vpop.permute.xlu1 %533 }
  0xe7   : > { %509 = vst.msk [vmem:[#allocation2 + $0x60] ss:$8 sm:$0x7] %vm1135_vm0, %v506_v14  ;;  %v524_v16 = vpop.permute.xlu0 %523  ;;  %v535_v17 = vrot.slane %v534_v15, 1 }
  0xe8   : > { %v525_v19 = vrot.slane %v524_v16, 1 }
  0xe9   : > { %v536_v23 = vsel %vm277_vm8, %v534_v15, %v535_v17 }
  0xea   : > { %v526_v24 = vsel %vm266_vm9, %v524_v16, %v525_v19  ;;  %v552_v25 = vld [vmem:[#allocation2 + $0x50] sm:$0xff]  ;;  %v553_v26 = vld [vmem:[#allocation2 + $0x58] sm:$0xff]  ;;  %v551_v27 = vld [vmem:[#allocation2 + $0x48] sm:$0xff]  ;;  %539 = vst.msk [vmem:[#allocation2 + $0x63] ss:$8 sm:$0x7] %vm1135_vm0, %v536_v23 }
  0xeb   : > { %529 = vst.msk [vmem:[#allocation2 + $0x62] ss:$8 sm:$0x7] %vm1135_vm0, %v526_v24  ;;  %v561_v28 = vpack.c.bf16 %v552_v25, %v549_v20  ;;  %v562_v29 = vpack.c.bf16 %v553_v26, %v550_v21  ;;  %v560_v30 = vpack.c.bf16 %v551_v27, %v548_v22 }
  0xed   : > { %588 = vmatprep.subr.bf16.mxu0 %v561_v28  ;;  %804 = vmatpush3.bf16.msra.mxu1 %v562_v29 }
  0xee   : > { %589 = vmatpush1.bf16.msra.mxu0 %v560_v30  ;;  %805 = vmatprep.subr.bf16.mxu1 %v978_v18 }
  0xf2   : > { %v555_v31 = vld [vmem:[#allocation2 + $0x68] sm:$0xf]  ;;  %v554_v32 = vld [vmem:[#allocation2 + $0x60] sm:$0xf]  ;;  %v556_v33 = vld [vmem:[#allocation2 + $0x70] sm:$0xf] }
  0xf3   : > { %v564_v34 = vpack.c.bf16 %v555_v31, %v555_v31  ;;  %v563_v35 = vpack.c.bf16 %v554_v32, %v554_v32  ;;  %v565_v36 = vpack.c.bf16 %v556_v33, %v556_v33 }
  0xf5   : > { %790 = vmatprep.subr.msk.bf16.mxu0 %vm576_vm10, %v564_v34  ;;  %v578_v11 = vsel %vm576_vm10, %v563_v35, 0  ;;  %v584_v37 = vsel %vm576_vm10, %v565_v36, 0 }
  0xf6   : > { %591 = vmatpush1.bf16.msra.mxu0 %v578_v11  ;;  %806 = vmatpush3.bf16.msra.mxu1 %v584_v37 }
  0xf8   : > { %v570_v18 = vpop.permute.xlu0 %569 }
  0xf9   : > { %791 = vmatmul.mubr.msk.bf16.vlgmr.msra.gmra.mrb[0].mxu0 %vm572_vm11, %v541_v38  ;;  %808 = vmatmul.mubr.msk.bf16.vlgmr.msra.gmra.mrb[0].mxu1 %vm572_vm11, %v541_v38 }
 0x1cc   : > { %v620_v39 = vpop.f32.mrb[0].mxu0  ;;  %v661_v40 = vpop.f32.mrb[0].mxu1 }
 0x1cd   : > { %v621_v41 = vadd.f32 %v620_v39, %v570_v18  ;;  %v662_v42 = vadd.f32 %v661_v40, %v570_v18  ;;  %v622_v43 = vpop.f32.mrb[1].mxu0  ;;  %v809_v44 = vpop.f32.mrb[1].mxu1 }
 0x1ce   : > { %v623_v45 = vadd.f32 %v622_v43, %v570_v18  ;;  %v624_v46 = vpop.f32.mrb[2].mxu0  ;;  %v664_v47 = vpop.f32.mrb[2].mxu1 }
 0x1cf   : > { %667 = vst [vmem:[%s186_s30] sm:$0xff] %v621_v41  ;;  %669 = vst [vmem:[%s186_s30 + $0x10] sm:$0xff] %v662_v42  ;;  %v625_v48 = vpop.f32.mrb[3].mxu0  ;;  %v810_v49 = vpop.f32.mrb[3].mxu1 }
 0x1d0   : > { %668 = vst [vmem:[%s186_s30 + $0x8] sm:$0xff] %v623_v45 }
 0x1d1   : > { %914 = shalt.err (!%p911_p4)
}
 0x1d2   : > { %s915_s29 = scalar_lea.hbm %s1308_s6, 384  ;;  %s919_s19 = scalar_lea.hbm %s1355_s3, 768 }
 0x1d3   : > { %p916_p5 = scmp.ne.s32.totalorder %s1308_s6, %s915_s29  ;;  %p920_p0 = scmp.lt.u32.totalorder %s1308_s6, %s1355_s3 }
 0x1d4   : > { %p921_p1 = scmp.lt.u32.totalorder %s919_s19, %s915_s29  ;;  %p923_p6 = scmp.lt.u32.totalorder %s915_s29, %s1308_s6 }
 0x1d5   : > { %p917_p8 = pnand %p916_p5, %p1366_p11 }
 0x1d6   : > { %p922_p3 = por %p921_p1, %p920_p0 }
 0x1d7   : > { %p918_p9 = pneg %p917_p8 }
 0x1d8   : > { %p924_p12 = por %p923_p6, %p922_p3 }
 0x1da   : > { %p925_p13 = pnand %p924_p12, %p918_p9 }
 0x1dc   : > { %928 = shalt.err (!%p925_p13)
}
 0x1dd   : > { %815 = dma.vmem_to_hbm [thread:$0]  (%p1366_p11), %s1310_s5, 384, %s1308_s6, %s671_s16  }
 0x1de PF: > { %s697_s26 = sand.u32 1, %s955_s12   ;;  %p1367_p7 = scmp.ne.s32.totalorder %s1360_s25, 0 }
 0x1df   : > { %p1368_p10 = scmp.ge.s32.totalorder %s967_s15, 2  ;;  %s698_s27 = scalar_lea.sflag [#allocation5], %s697_s26 }
 0x1e1   : > { %p822_p2 = pnand %p1368_p10, %p1367_p7 }
 0x1e3   : > { %950 = dma.done.wait (!%p822_p2), %s698_s27, 384  }
 0x1e4   : > { %952 = vsyncadd (!%p822_p2), %s698_s27, 4294966912  ;;  %p16_p4 = scmp.ge.s32.totalorder %s1027_s18, 4   ;;  %s1369_s12 = smov %s959_s13 }
 0x1e5   : > { %s1370_s13 = smov %s963_s14  ;;  %s1371_s14 = smov %s1039_s21 }
 0x1e6   : > { %s1372_s15 = smov %s1027_s18  ;;  %18 = sbr.rel (!%p16_p4) target bundleno = 5 (0x5), region = 118 }
 0x1ed   :  { %703 = vsyncpa [#allocation4], 1 }
 0x1ee   :  { %705 = vsyncpa [#allocation4 + $0x1], 1 }
 0x1ef   :  { %706 = vsyncpa [#allocation5], 1 }
 0x1f0   :  { %708 = vsyncpa [#allocation5 + $0x1], 1 }

</bundles_post_ra>
